<compile_context>
chip_gen: v6e
topology: v6e:2x2x1
jax: 0.10.0
libtpu: 0.0.40
codegen_flags: <defaults>
</compile_context>

<pallas_src>
import functools
from typing import NamedTuple

import jax
import jax.numpy as jnp
from jax.experimental import pallas as pl
from jax.experimental.pallas import tpu as pltpu


def _round_up(n, m):
    return pl.cdiv(n, m) * m


def _mlp_kernel(x_ref, w1_ref, b1_ref, w2_ref, b2_ref, o_ref):
    # x:  [TB, Din] f32 or bf16   w1: [Din, H] bf16   b1: [1, H]   f32
    # w2: [H, Dout] bf16          b2: [1, Dout] f32   o:  [TB, Dout] bf16/f32
    x = x_ref[...].astype(jnp.bfloat16)            # in-kernel cast (no HBM pass)
    h = jnp.dot(x, w1_ref[...], preferred_element_type=jnp.float32)
    h = jnp.maximum(h + b1_ref[...], 0.0)          # f32 bias + ReLU on the VPU
    y = jnp.dot(h.astype(w2_ref.dtype), w2_ref[...],   # bf16 MXU, f32 accumulate
                preferred_element_type=jnp.float32)
    o_ref[...] = (y + b2_ref[...]).astype(o_ref.dtype)


class MLPParams(NamedTuple):
    """Weights padded to lane-dense (multiple-of-128) shapes, cast once."""
    w1p: jax.Array   # [Dp_in, Hp]   bf16
    b1p: jax.Array   # [1, Hp]       f32
    w2p: jax.Array   # [Hp, Dp_out]  bf16
    b2p: jax.Array   # [1, Dp_out]   f32
    d_in: int
    d_out: int


def prepare_params(w1, b1, w2, b2):
    """Pad/cast the weights ONCE (hoisted out of the per-call path)."""
    d_in, h = w1.shape
    d_out = w2.shape[1]
    dp_in, hp, dp_out = (_round_up(d, 128) for d in (d_in, h, d_out))
    w1p = jnp.zeros((dp_in, hp), jnp.bfloat16).at[:d_in, :h].set(
        w1.astype(jnp.bfloat16))
    b1p = jnp.zeros((1, hp), jnp.float32).at[:, :h].set(
        b1.reshape(1, -1).astype(jnp.float32))
    w2p = jnp.zeros((hp, dp_out), jnp.bfloat16).at[:h, :d_out].set(
        w2.astype(jnp.bfloat16))
    b2p = jnp.zeros((1, dp_out), jnp.float32).at[:, :d_out].set(
        b2.reshape(1, -1).astype(jnp.float32))
    return MLPParams(w1p, b1p, w2p, b2p, d_in, d_out)


@functools.partial(jax.jit, static_argnames=("tb", "out_dtype"))
def _fused_mlp(xp, w1p, b1p, w2p, b2p, *, tb, out_dtype):
    bp, dp_in = xp.shape
    hp = w1p.shape[1]
    dp_out = w2p.shape[1]
    grid = (bp // tb,)

    # Resident-weight footprint; single-buffer the weights once they are big
    # enough for double-buffering to matter (v7x has only 64 MiB VMEM).  The
    # constant index_map means they never re-DMA anyway.
    resident_w_bytes = (w1p.size + w2p.size) * w1p.dtype.itemsize
    w_kwargs = {}
    n_w_buf = 2
    if resident_w_bytes > (8 << 20):
        w_kwargs = dict(pipeline_mode=pl.Buffered(1))
        n_w_buf = 1

    out_isize = jnp.dtype(out_dtype).itemsize
    x_tile_bytes = 2 * tb * dp_in * xp.dtype.itemsize          # double-buffered
    out_tile_bytes = 2 * tb * dp_out * out_isize               # double-buffered
    bias_bytes = (b1p.size + b2p.size) * 4
    interm_bytes = tb * hp * 4 + tb * dp_out * 4               # f32 h / y tiles
    needed = (x_tile_bytes + out_tile_bytes + interm_bytes
              + n_w_buf * (resident_w_bytes + bias_bytes))
    # Clamp to 64 MiB (v7x physical); raise toward ~100 MiB on v5e/v6e if you
    # push much larger batch tiles / weight sizes.
    vmem_limit = int(min(max(2 * needed, 32 << 20), 64 << 20))

    flops = 2 * bp * (dp_in * hp + hp * dp_out)
    bytes_accessed = (xp.size * xp.dtype.itemsize
                      + w1p.size * 2 + w2p.size * 2
                      + b1p.size * 4 + b2p.size * 4
                      + bp * dp_out * out_isize)

    return pl.pallas_call(
        _mlp_kernel,
        out_shape=jax.ShapeDtypeStruct((bp, dp_out), out_dtype),
        grid_spec=pltpu.PrefetchScalarGridSpec(
            num_scalar_prefetch=0,
            grid=grid,
            in_specs=[
                # x: tiled over the batch grid axis (pipelined/double-buffered)
                pl.BlockSpec((tb, dp_in), lambda i: (i, 0)),
                # weights & biases: constant index_map -> resident in VMEM
                pl.BlockSpec((dp_in, hp), lambda i: (0, 0), **w_kwargs),
                pl.BlockSpec((1, hp), lambda i: (0, 0)),
                pl.BlockSpec((hp, dp_out), lambda i: (0, 0), **w_kwargs),
                pl.BlockSpec((1, dp_out), lambda i: (0, 0)),
            ],
            out_specs=pl.BlockSpec((tb, dp_out), lambda i: (i, 0)),
        ),
        compiler_params=pltpu.CompilerParams(
            dimension_semantics=("parallel",),
            vmem_limit_bytes=vmem_limit),
        cost_estimate=pl.CostEstimate(
            flops=flops, transcendentals=0, bytes_accessed=bytes_accessed),
    )(xp, w1p, b1p, w2p, b2p)


def mlp_forward(x, params, *, block_b=2048):
    """Fused MLP forward: relu(x @ w1 + b1) @ w2 + b2 (f32 in, f32 out)."""
    B, d_in = x.shape
    assert d_in == params.d_in
    dp_in = params.w1p.shape[0]

    # Batch tile: multiple of 16 (bf16 sublane packing), sized so that for
    # B > 16 the grid has >=2 steps (both v7x TensorCores get work), capped
    # at block_b to amortize the ~0.35us fixed per-grid-step overhead.
    tb = min(block_b, max(16, _round_up(pl.cdiv(_round_up(B, 16), 2), 16)))
    tb = _round_up(tb, 16)
    bp = _round_up(B, tb)

    if bp == B and dp_in == d_in:
        # Aligned (real-model) path: no wrapper-side copy of x; the kernel
        # reads f32 straight from HBM and casts to bf16 on-chip.
        xp = x
    else:
        # Misaligned path: zero-pad (exact for Linear+ReLU), pad in bf16 to
        # keep the extra HBM traffic minimal.
        xp = jnp.zeros((bp, dp_in), jnp.bfloat16).at[:B, :d_in].set(
            x.astype(jnp.bfloat16))

    out = _fused_mlp(xp, params.w1p, params.b1p, params.w2p, params.b2p,
                     tb=tb, out_dtype=jnp.bfloat16)
    # Strip batch / lane padding on the (tiny) real slice, upcast to f32.
    return out[:B, :params.d_out].astype(jnp.float32)


def init_params(key, input_size, hidden_size, output_size):
    """Deterministic PyTorch-Linear-style init: U(-1/sqrt(fan_in), 1/sqrt(fan_in))."""
    k1, k2, k3, k4 = jax.random.split(key, 4)
    s1 = 1.0 / jnp.sqrt(jnp.float32(input_size))
    s2 = 1.0 / jnp.sqrt(jnp.float32(hidden_size))
    w1 = jax.random.uniform(k1, (input_size, hidden_size), jnp.float32, -s1, s1)
    b1 = jax.random.uniform(k2, (1, hidden_size), jnp.float32, -s1, s1)
    w2 = jax.random.uniform(k3, (hidden_size, output_size), jnp.float32, -s2, s2)
    b2 = jax.random.uniform(k4, (1, output_size), jnp.float32, -s2, s2)
    return w1, b1, w2, b2


if __name__ == "__main__":
    key = jax.random.PRNGKey(0)
    batch, input_size, hidden_size, output_size = 8, 32, 32, 16

    kx, kp = jax.random.split(key)
    features = jax.random.normal(kx, (batch, input_size), jnp.float32)
    w1, b1, w2, b2 = init_params(kp, input_size, hidden_size, output_size)

    # Pad/cast weights once (hoisted out of the per-call path).
    params = prepare_params(w1, b1, w2, b2)

    out = mlp_forward(features, params)
    out = jax.block_until_ready(out)
    assert out.shape == (batch, output_size)

    # Reference 1: emulate the kernel's bf16 quantization (operands, hidden,
    # and final output) in pure JAX with f32 accumulation -> tight match.
    to32 = lambda a: a.astype(jnp.bfloat16).astype(jnp.float32)
    h_ref = jnp.maximum(to32(features) @ to32(w1) + b1, 0.0)
    ref_bf16 = to32(to32(h_ref) @ to32(w2) + b2)
    assert jnp.allclose(out, ref_bf16, atol=1e-2, rtol=1e-2)

    # Reference 2: full-f32 math, loose tolerance (bf16 quantization error).
    ref_f32 = jnp.maximum(features @ w1 + b1, 0.0) @ w2 + b2
    assert jnp.allclose(out, ref_f32, atol=5e-2, rtol=5e-2)

    print("KERNEL_OK")
</pallas_src>

<mosaic_0001>
module attributes {stable_mosaic.version = 11 : i64} {
  func.func @_mlp_kernel(%arg0: i32, %arg1: memref<16x128xbf16, #tpu.memory_space<vmem>>, %arg2: memref<128x128xbf16, #tpu.memory_space<vmem>>, %arg3: memref<1x128xf32, #tpu.memory_space<vmem>>, %arg4: memref<128x128xbf16, #tpu.memory_space<vmem>>, %arg5: memref<1x128xf32, #tpu.memory_space<vmem>>, %arg6: memref<16x128xbf16, #tpu.memory_space<vmem>>) attributes {dimension_semantics = [#tpu.dimension_semantics<parallel>], iteration_bounds = array<i64: 1>, scalar_prefetch = 0 : i64, scratch_operands = 0 : i64, tpu.core_type = #tpu.core_type<tc>, window_params = [{transform_indices = @transform_0, window_bounds = array<i64: 16, 128>}, {pipeline_mode = #tpu.pipeline_mode<synchronous>, transform_indices = @transform_1, window_bounds = array<i64: 128, 128>}, {pipeline_mode = #tpu.pipeline_mode<synchronous>, transform_indices = @transform_2, window_bounds = array<i64: 1, 128>}, {pipeline_mode = #tpu.pipeline_mode<synchronous>, transform_indices = @transform_3, window_bounds = array<i64: 128, 128>}, {pipeline_mode = #tpu.pipeline_mode<synchronous>, transform_indices = @transform_4, window_bounds = array<i64: 1, 128>}, {transform_indices = @transform_5, window_bounds = array<i64: 16, 128>}]} {
    %c0 = arith.constant 0 : index
    %c0_0 = arith.constant 0 : index
    %0 = vector.load %arg1[%c0, %c0_0] : memref<16x128xbf16, #tpu.memory_space<vmem>>, vector<16x128xbf16>
    %c0_1 = arith.constant 0 : index
    %c0_2 = arith.constant 0 : index
    %1 = vector.load %arg2[%c0_1, %c0_2] : memref<128x128xbf16, #tpu.memory_space<vmem>>, vector<128x128xbf16>
    %cst = arith.constant dense<0.000000e+00> : vector<16x128xf32>
    %2 = tpu.matmul %0, %1, %cst {dimension_numbers = #tpu.dot_dimension_numbers<[1], [0], [0], [1], [0, 0, 1, 1], [], []>} : vector<16x128xbf16>, vector<128x128xbf16>, vector<16x128xf32> -> vector<16x128xf32>
    %c0_3 = arith.constant 0 : index
    %c0_4 = arith.constant 0 : index
    %3 = vector.load %arg3[%c0_3, %c0_4] : memref<1x128xf32, #tpu.memory_space<vmem>>, vector<1x128xf32>
    %4 = vector.broadcast %3 : vector<1x128xf32> to vector<16x128xf32>
    %5 = arith.addf %2, %4 : vector<16x128xf32>
    %cst_5 = arith.constant 0.000000e+00 : f32
    %6 = vector.broadcast %cst_5 : f32 to vector<16x128xf32>
    %7 = arith.maximumf %5, %6 : vector<16x128xf32>
    %8 = arith.truncf %7 : vector<16x128xf32> to vector<16x128xbf16>
    %c0_6 = arith.constant 0 : index
    %c0_7 = arith.constant 0 : index
    %9 = vector.load %arg4[%c0_6, %c0_7] : memref<128x128xbf16, #tpu.memory_space<vmem>>, vector<128x128xbf16>
    %cst_8 = arith.constant dense<0.000000e+00> : vector<16x128xf32>
    %10 = tpu.matmul %8, %9, %cst_8 {dimension_numbers = #tpu.dot_dimension_numbers<[1], [0], [0], [1], [0, 0, 1, 1], [], []>} : vector<16x128xbf16>, vector<128x128xbf16>, vector<16x128xf32> -> vector<16x128xf32>
    %c0_9 = arith.constant 0 : index
    %c0_10 = arith.constant 0 : index
    %11 = vector.load %arg5[%c0_9, %c0_10] : memref<1x128xf32, #tpu.memory_space<vmem>>, vector<1x128xf32>
    %12 = vector.broadcast %11 : vector<1x128xf32> to vector<16x128xf32>
    %13 = arith.addf %10, %12 : vector<16x128xf32>
    %14 = arith.truncf %13 : vector<16x128xf32> to vector<16x128xbf16>
    %c0_11 = arith.constant 0 : index
    %c0_12 = arith.constant 0 : index
    %15 = vector.load %arg6[%c0_11, %c0_12] : memref<16x128xbf16, #tpu.memory_space<vmem>>, vector<16x128xbf16>
    tpu.vector_store %arg6[%c0_11, %c0_12], %14 {strides = array<i32>} : memref<16x128xbf16, #tpu.memory_space<vmem>>, vector<16x128xbf16>,
    return
  }
  func.func @transform_0(%arg0: i32) -> (i32, i32) {
    %c0_i32 = arith.constant 0 : i32
    %c0_i32_0 = arith.constant 0 : i32
    return %arg0, %c0_i32 : i32, i32
  }
  func.func @transform_1(%arg0: i32) -> (i32, i32) {
    %c0_i32 = arith.constant 0 : i32
    %c0_i32_0 = arith.constant 0 : i32
    %c0_i32_1 = arith.constant 0 : i32
    return %c0_i32, %c0_i32_0 : i32, i32
  }
  func.func @transform_2(%arg0: i32) -> (i32, i32) {
    %c0_i32 = arith.constant 0 : i32
    %c0_i32_0 = arith.constant 0 : i32
    %c0_i32_1 = arith.constant 0 : i32
    return %c0_i32, %c0_i32_0 : i32, i32
  }
  func.func @transform_3(%arg0: i32) -> (i32, i32) {
    %c0_i32 = arith.constant 0 : i32
    %c0_i32_0 = arith.constant 0 : i32
    %c0_i32_1 = arith.constant 0 : i32
    return %c0_i32, %c0_i32_0 : i32, i32
  }
  func.func @transform_4(%arg0: i32) -> (i32, i32) {
    %c0_i32 = arith.constant 0 : i32
    %c0_i32_0 = arith.constant 0 : i32
    %c0_i32_1 = arith.constant 0 : i32
    return %c0_i32, %c0_i32_0 : i32, i32
  }
  func.func @transform_5(%arg0: i32) -> (i32, i32) {
    %c0_i32 = arith.constant 0 : i32
    %c0_i32_0 = arith.constant 0 : i32
    return %arg0, %c0_i32 : i32, i32
  }
}

</mosaic_0001>

<bundles_post_ra>
// kernel: _fused_mlp.1
= control target key start
LH: loop header
LB: loop body
LE: loop exit
PB: predicated region body
PF: predicated region fallthrough
CT: control target
= control target key end

     0   :  { %10 = vsyncpa [#allocation3], 0  ;;  %s591_s0 = inlined_call_operand.hbm [shape: bf16[16,128], index: 0, kind: input, shape index: {}]   ;;  %s592_s1 = inlined_call_operand.hbm [shape: bf16[128,128], index: 1, kind: input, shape index: {}]   ;;  %s593_s2 = inlined_call_operand.vmem [shape: f32[1,128], index: 2, kind: input, shape index: {}]   ;;  %s594_s3 = inlined_call_operand.hbm [shape: bf16[128,128], index: 3, kind: input, shape index: {}]   ;;  %s595_s4 = inlined_call_operand.vmem [shape: f32[1,128], index: 4, kind: input, shape index: {}]   ;;  %s596_s5 = inlined_call_operand.hbm [shape: bf16[16,128], index: 5, kind: output, shape index: {}]  }
   0x1   :  { %11 = vsyncpa [#allocation6], 0 }
   0x2   :  { %12 = vsyncpa [#allocation4], 0  ;;  %s523_s18 = smov [#allocation5]   ;;  %s524_s20 = smov [#allocation2]  }
   0x3   :  { %s30_s19 = sshll.u32 %s523_s18, 4  ;;  %s18_s21 = sshll.u32 %s524_s20, 4  ;;  %s31_s19 = int_to_ptr.vmem [resolvable:$true] %s30_s19  ;;  %s19_s21 = int_to_ptr.vmem [resolvable:$true] %s18_s21 }
   0x4   :  { %s445_s22 = scalar_lea.vmem %s31_s19, 1024  ;;  %p450_p1 = scmp.lt.s32.totalorder %s31_s19, %s31_s19 }
   0x5   :  { %p446_p0 = scmp.ne.s32.totalorder %s31_s19, %s445_s22  ;;  %p451_p2 = scmp.lt.s32.totalorder %s445_s22, %s445_s22 }
   0x7   :  { %p452_p3 = por %p451_p2, %p450_p1 }
   0x9   :  { %p453_p4 = pnand %p452_p3, %p446_p0 }
   0xb   :  { %456 = shalt.err (!%p453_p4)
}
   0xc   :  { %s525_s23 = smov 64   ;;  %s526_s24 = smov 4  }
   0xd   :  { %36 = dma.hbm_to_vmem [thread:$0]  %s592_s1, 1024, %s31_s19, [#allocation6], %s525_s23, %s525_s23, %s526_s24  }
   0xe   :  { %s465_s27 = scalar_lea.vmem %s19_s21, 128  ;;  %p470_p6 = scmp.lt.s32.totalorder %s19_s21, %s19_s21 }
   0xf   :  { %p466_p5 = scmp.ne.s32.totalorder %s19_s21, %s465_s27  ;;  %p471_p7 = scmp.lt.s32.totalorder %s465_s27, %s465_s27 }
  0x11   :  { %p472_p8 = por %p471_p7, %p470_p6 }
  0x13   :  { %p473_p9 = pnand %p472_p8, %p466_p5 }
  0x15   :  { %476 = shalt.err (!%p473_p9)
}
  0x16   :  { %24 = dma.hbm_to_vmem [thread:$0]  %s591_s0, 128, %s19_s21, [#allocation3], %s525_s23, %s525_s23, %s526_s24  }
  0x17   :  { %s527_s30 = smov [#allocation7]  }
  0x18   :  { %s44_s6 = sshll.u32 %s527_s30, 4  ;;  %s45_s6 = int_to_ptr.vmem [resolvable:$true] %s44_s6 }
  0x19   :  { %s485_s7 = scalar_lea.vmem %s45_s6, 1024  ;;  %p490_p11 = scmp.lt.s32.totalorder %s45_s6, %s45_s6 }
  0x1a   :  { %p486_p10 = scmp.ne.s32.totalorder %s45_s6, %s485_s7  ;;  %p491_p12 = scmp.lt.s32.totalorder %s485_s7, %s485_s7 }
  0x1c   :  { %p492_p13 = por %p491_p12, %p490_p11 }
  0x1e   :  { %p493_p0 = pnand %p492_p13, %p486_p10 }
  0x20   :  { %496 = shalt.err (!%p493_p0)
}
  0x21   :  { %50 = dma.hbm_to_vmem [thread:$0]  %s594_s3, 1024, %s45_s6, [#allocation6], %s525_s23, %s525_s23, %s526_s24  }
  0x22   :  { %517 = dma.done.wait [#allocation3], 128  }
  0x23   :  { %518 = vsyncadd [#allocation3], 4294967168 }
  0x24   :  { %519 = dma.done.wait [#allocation6], 2048  }
  0x25   :  { %520 = vsyncadd [#allocation6], 4294965248  ;;  %v528_v0 = vmov 0.0   ;;  %vm529_vm0 = vmmov 0   ;;  %v420_v1 = vld [vmem:[#allocation5 + $0x38] sm:$0xff]   ;;  %v421_v2 = vld [vmem:[#allocation5 + $0x30] sm:$0xff]  }
  0x26   :  { %372 = vmatprep.subr.bf16.mxu0 %v528_v0  ;;  %388 = vmatprep.mubr.msk.bf16.mxu0 %vm529_vm0, %v528_v0  ;;  %v422_v3 = vld [vmem:[#allocation5 + $0x28] sm:$0xff]   ;;  %v429_v4 = vld [vmem:[#allocation7 + $0x38] sm:$0xff]   ;;  %v423_v5 = vld [vmem:[#allocation5 + $0x20] sm:$0xff]   ;;  %s530_s11 = smov [#allocation8]  }
  0x27   :  { %392 = vmatprep.subr.bf16.mxu1 %v528_v0  ;;  %408 = vmatprep.mubr.msk.bf16.mxu1 %vm529_vm0, %v528_v0  ;;  %v430_v6 = vld [vmem:[#allocation7 + $0x30] sm:$0xff]   ;;  %v424_v7 = vld [vmem:[#allocation5 + $0x18] sm:$0xff]   ;;  %v431_v8 = vld [vmem:[#allocation7 + $0x28] sm:$0xff]   ;;  %s313_s12 = sshll.u32 %s530_s11, 4  ;;  %s314_s12 = int_to_ptr.vmem [resolvable:$true] %s313_s12 }
  0x28   :  { %373 = vmatpush3.bf16.msra.mxu0 %v420_v1  ;;  %393 = vmatpush3.bf16.msra.mxu1 %v429_v4  ;;  %v425_v9 = vld [vmem:[#allocation5 + $0x10] sm:$0xff]   ;;  %v432_v10 = vld [vmem:[#allocation7 + $0x20] sm:$0xff]   ;;  %v426_v11 = vld [vmem:[#allocation5 + $0x8] sm:$0xff]   ;;  %p502_p2 = scmp.lt.s32.totalorder %s314_s12, %s314_s12 }
  0x29   :  { %374 = vmatprep.subr.bf16.mxu0 %v528_v0  ;;  %394 = vmatprep.subr.bf16.mxu1 %v528_v0  ;;  %v433_v12 = vld [vmem:[#allocation7 + $0x18] sm:$0xff]   ;;  %v427_v13 = vld [vmem:[#allocation5] sm:$0xff]   ;;  %v434_v15 = vld [vmem:[#allocation7 + $0x10] sm:$0xff]  }
  0x2a   :  { %v428_v14 = vld [vmem:[#allocation2] sm:$0xff]   ;;  %v435_v16 = vld [vmem:[#allocation7 + $0x8] sm:$0xff]   ;;  %v436_v17 = vld [vmem:[#allocation7] sm:$0xff]  }
  0x2b   :  { %v326_v18 = vld [vmem:[%s593_s2] ss:$0 sm:$0xff]  ;;  %s497_s2 = scalar_lea.vmem %s314_s12, 128 }
  0x2c   :  { %375 = vmatpush3.bf16.msra.mxu0 %v421_v2  ;;  %395 = vmatpush3.bf16.msra.mxu1 %v430_v6  ;;  %v336_v29 = vld [vmem:[%s595_s4] ss:$0 sm:$0xff]  ;;  %p498_p1 = scmp.ne.s32.totalorder %s314_s12, %s497_s2  ;;  %p503_p3 = scmp.lt.s32.totalorder %s497_s2, %s497_s2 }
  0x2d   :  { %376 = vmatprep.subr.bf16.mxu0 %v528_v0  ;;  %396 = vmatprep.subr.bf16.mxu1 %v528_v0 }
  0x2e   :  { %p504_p4 = por %p503_p3, %p502_p2 }
  0x30   :  { %377 = vmatpush3.bf16.msra.mxu0 %v422_v3  ;;  %397 = vmatpush3.bf16.msra.mxu1 %v431_v8  ;;  %p505_p5 = pnand %p504_p4, %p498_p1 }
  0x31   :  { %378 = vmatprep.subr.bf16.mxu0 %v528_v0  ;;  %398 = vmatprep.subr.bf16.mxu1 %v528_v0 }
  0x34   :  { %379 = vmatpush3.bf16.msra.mxu0 %v423_v5  ;;  %399 = vmatpush3.bf16.msra.mxu1 %v432_v10 }
  0x35   :  { %380 = vmatprep.subr.bf16.mxu0 %v528_v0  ;;  %400 = vmatprep.subr.bf16.mxu1 %v528_v0 }
  0x38   :  { %381 = vmatpush3.bf16.msra.mxu0 %v424_v7  ;;  %401 = vmatpush3.bf16.msra.mxu1 %v433_v12 }
  0x39   :  { %382 = vmatprep.subr.bf16.mxu0 %v528_v0  ;;  %402 = vmatprep.subr.bf16.mxu1 %v528_v0 }
  0x3c   :  { %383 = vmatpush3.bf16.msra.mxu0 %v425_v9  ;;  %403 = vmatpush3.bf16.msra.mxu1 %v434_v15 }
  0x3d   :  { %384 = vmatprep.subr.bf16.mxu0 %v528_v0  ;;  %404 = vmatprep.subr.bf16.mxu1 %v528_v0 }
  0x40   :  { %385 = vmatpush3.bf16.msra.mxu0 %v426_v11  ;;  %405 = vmatpush3.bf16.msra.mxu1 %v435_v16 }
  0x41   :  { %386 = vmatprep.subr.bf16.mxu0 %v528_v0  ;;  %406 = vmatprep.subr.bf16.mxu1 %v528_v0 }
  0x44   :  { %387 = vmatpush3.bf16.msra.mxu0 %v427_v13  ;;  %407 = vmatpush3.bf16.msra.mxu1 %v436_v17 }
  0x47   :  { %389 = vmatmul.mubr.bf16.vlgmr.msra.gmra.mxu0 %v428_v14 }
 0x107   :  { %v176_v19 = vpop.f32.mrf.mxu0 }
 0x108   :  { %v177_v21 = vadd.f32 %v326_v18, %v176_v19 }
 0x109   :  { %v390_v20 = vpop.f32.mrf.mxu0 }
 0x10a   :  { %v183_v25 = vmax.f32 %v177_v21, 0.0 }
 0x10b   :  { %v179_v22 = vpop.f32.mrf.mxu0 }
 0x10c   :  { %v180_v23 = vadd.f32 %v326_v18, %v179_v22 }
 0x10d   :  { %v391_v24 = vpop.f32.mrf.mxu0 }
 0x10e   :  { %v184_v26 = vmax.f32 %v180_v23, 0.0 }
 0x110   :  { %v185_v27 = vpack.c.bf16 %v184_v26, %v183_v25 }
 0x112   :  { %409 = vmatmul.mubr.bf16.vlgmr.msra.gmra.mxu1 %v185_v27 }
 0x1d2   :  { %v291_v28 = vpop.f32.mrf.mxu1 }
 0x1d3   :  { %v292_v32 = vadd.f32 %v336_v29, %v291_v28 }
 0x1d4   :  { %v410_v30 = vpop.f32.mrf.mxu1 }
 0x1d6   :  { %v294_v31 = vpop.f32.mrf.mxu1 }
 0x1d7   :  { %v295_v33 = vadd.f32 %v336_v29, %v294_v31 }
 0x1d8   :  { %v411_v34 = vpop.f32.mrf.mxu1 }
 0x1d9   :  { %v352_v35 = vpack.c.bf16 %v295_v33, %v292_v32 }
 0x1db   :  { %353 = vst [vmem:[#allocation8] sm:$0xff] %v352_v35  }
 0x1dc   :  { %508 = shalt.err (!%p505_p5)
}
 0x1dd   :  { %319 = dma.vmem_to_hbm [thread:$0]  %s314_s12, 128, %s596_s5, [#allocation4], %s525_s23, %s525_s23, %s526_s24  }
 0x1de   :  { %521 = dma.done.wait [#allocation4], 128  }
 0x1df   :  { %522 = vsyncadd [#allocation4], 4294967168 }
 0x1e0   :  { %323 = vsyncpa [#allocation3], 1 }
 0x1e1   :  { %324 = vsyncpa [#allocation6], 1 }
 0x1e2   :  { %325 = vsyncpa [#allocation4], 1 }

</bundles_post_ra>
